<compile_context>
chip_gen: v7x
topology: tpu7x:2x2x1
jax: 0.10.0
libtpu: 0.0.40
codegen_flags: <defaults>
</compile_context>

<pallas_src>
import functools

import jax
import jax.numpy as jnp
from jax.experimental import pallas as pl
from jax.experimental.pallas import tpu as pltpu

EPS = 1e-6


# ----------------------------------------------------------------------------
# Kernel
# ----------------------------------------------------------------------------
def _layernorm_kernel(alpha_ref, bias_ref, x_ref, o_ref, *, eps):
    # x_ref block: (block_rows, hidden); hidden lives on the lane (last) axis and
    # is never tiled, so the full row reduction happens inside one block.
    x = x_ref[...]
    h = x.shape[-1]                       # static
    xf = x.astype(jnp.float32)

    # Single pass over the tile: both moments from one read.
    s = jnp.sum(xf, axis=-1, keepdims=True)
    ss = jnp.sum(xf * xf, axis=-1, keepdims=True)
    mean = s * (1.0 / h)
    # Unbiased variance (torch.std default, correction=1). Clamp tiny negative
    # rounding noise from the E[x^2]-E[x]^2 form before sqrt.
    inv_hm1 = (1.0 / (h - 1)) if h > 1 else float("nan")   # torch gives nan for h==1
    var = jnp.maximum(ss - h * (mean * mean), 0.0) * inv_hm1
    std = jnp.sqrt(var)

    # One exact reciprocal per ROW (hidden x fewer divides than a per-element
    # divide); fold alpha/bias in so the per-element work is a single madd.
    inv = pl.reciprocal(std + eps)        # (block_rows, 1)
    scale = alpha_ref[0] * inv
    shift = bias_ref[0] - mean * scale
    o_ref[...] = (xf * scale + shift).astype(o_ref.dtype)


# ----------------------------------------------------------------------------
# Tiling heuristics
# ----------------------------------------------------------------------------
def _round_up(x, m):
    return ((x + m - 1) // m) * m


def _tile_plan(rows, hidden, dtype):
    """Pick (block_rows, vmem_limit_bytes) sized to the chip's VMEM."""
    itemsize = jnp.dtype(dtype).itemsize
    sublane = {1: 32, 2: 16}.get(itemsize, 8)     # min sublane tile per dtype

    # Conservative default working-set budget that fits the universal 32 MiB
    # default scoped-VMEM limit (and v7x's 64 MiB physical VMEM) with headroom.
    budget = 24 * 1024 * 1024
    vmem_limit = None
    try:
        info = pltpu.get_tpu_info()
        vmem_bytes = getattr(info, "vmem_capacity_bytes", None)
        if vmem_bytes is not None and vmem_bytes >= 96 * 1024 * 1024:
            # v5e / v6e (128 MiB VMEM): bigger tiles + raise the scoped limit.
            budget = 48 * 1024 * 1024
            vmem_limit = 80 * 1024 * 1024
    except Exception:
        pass  # unknown chip -> stay with the conservative defaults

    # Approximate per-row VMEM footprint:
    #   double-buffered input tile + double-buffered output tile (native dtype)
    #   + ~3 fp32-sized temporaries inside the kernel body.
    per_row = hidden * (4 * itemsize + 3 * 4)
    block_rows = max(sublane, (budget // max(per_row, 1)) // sublane * sublane)

    rows_ceil = _round_up(rows, sublane)
    block_rows = min(block_rows, rows_ceil)       # never bigger than the data
    # Keep at least 2 grid steps when there is enough work so both of v7x's
    # TensorCores get a share of the "parallel" grid axis.
    if rows_ceil >= 2 * sublane:
        block_rows = min(block_rows, _round_up((rows + 1) // 2, sublane))
    return block_rows, vmem_limit


# ----------------------------------------------------------------------------
# Wrapper
# ----------------------------------------------------------------------------
@functools.partial(jax.jit, static_argnames=("eps",))
def layer_normalization(x, alpha, bias, eps=EPS):
    """Pallas-TPU equivalent of the PyTorch LayerNormalization.forward.

    x: (..., hidden); alpha, bias: shape (1,) learnable scalars.
    """
    orig_shape = x.shape
    h = orig_shape[-1]
    x2 = x.reshape(-1, h)                 # (rows, hidden); hidden -> lane axis
    rows = x2.shape[0]

    # SMEM scalars are 32-bit; keep the scalar params in fp32 regardless of x dtype.
    alpha32 = alpha.reshape(-1).astype(jnp.float32)
    bias32 = bias.reshape(-1).astype(jnp.float32)

    block_rows, vmem_limit = _tile_plan(rows, h, x2.dtype)
    grid = pl.cdiv(rows, block_rows)      # ragged last block handled by Pallas
                                          # (no wrapper-side pad/concat/slice)

    kernel = functools.partial(_layernorm_kernel, eps=float(eps))

    out = pl.pallas_call(
        kernel,
        out_shape=jax.ShapeDtypeStruct((rows, h), x2.dtype),
        grid_spec=pltpu.PrefetchScalarGridSpec(
            num_scalar_prefetch=0,
            grid=(grid,),
            in_specs=[
                pl.BlockSpec(memory_space=pltpu.SMEM),            # alpha (1,)
                pl.BlockSpec(memory_space=pltpu.SMEM),            # bias  (1,)
                pl.BlockSpec((block_rows, h), lambda i: (i, 0)),  # x tile
            ],
            out_specs=pl.BlockSpec((block_rows, h), lambda i: (i, 0)),
        ),
        compiler_params=pltpu.CompilerParams(
            dimension_semantics=("parallel",),
            vmem_limit_bytes=vmem_limit,
        ),
    )(alpha32, bias32, x2)

    return out.reshape(orig_shape)


# ----------------------------------------------------------------------------
# Pure-JAX reference (the contract: torch.std is unbiased, eps added to std)
# ----------------------------------------------------------------------------
def reference_layernorm(x, alpha, bias, eps=EPS):
    xf = x.astype(jnp.float32)
    mean = jnp.mean(xf, axis=-1, keepdims=True)
    var = jnp.sum((xf - mean) ** 2, axis=-1, keepdims=True) / (xf.shape[-1] - 1)
    std = jnp.sqrt(var)
    return (alpha[0] * (xf - mean) / (std + eps) + bias[0]).astype(x.dtype)


if __name__ == "__main__":
    key = jax.random.PRNGKey(0)
    k0, k1, k2 = jax.random.split(key, 3)

    # Parameters: nn.Parameter(torch.ones(1)) / nn.Parameter(torch.zeros(1))
    alpha = jnp.ones((1,), dtype=jnp.float32)
    bias = jnp.zeros((1,), dtype=jnp.float32)

    # 1) Small fp32 case matching the module's expected layout (batch, seq, hidden).
    batch, seq, hidden = 2, 8, 32
    x = jax.random.normal(k0, (batch, seq, hidden), dtype=jnp.float32)
    out = jax.block_until_ready(layer_normalization(x, alpha, bias))
    ref = reference_layernorm(x, alpha, bias)
    assert out.shape == x.shape
    assert jnp.allclose(out, ref, atol=1e-4, rtol=1e-4), "fp32 mismatch vs reference"

    # 2) Ragged row count (rows not a multiple of the block) -> masked last block.
    x_ragged = jax.random.normal(k1, (3, 5, 128), dtype=jnp.float32)
    out_r = jax.block_until_ready(layer_normalization(x_ragged, alpha, bias))
    ref_r = reference_layernorm(x_ragged, alpha, bias)
    assert jnp.allclose(out_r, ref_r, atol=1e-4, rtol=1e-4), "ragged mismatch"

    # 3) bf16 input (dtype-aware sublane = 16, fp32 math inside the kernel).
    x_bf16 = jax.random.normal(k2, (2, 8, 128), dtype=jnp.float32).astype(jnp.bfloat16)
    out_b = jax.block_until_ready(layer_normalization(x_bf16, alpha, bias))
    ref_b = reference_layernorm(x_bf16, alpha, bias)
    assert jnp.allclose(out_b.astype(jnp.float32), ref_b.astype(jnp.float32),
                        atol=1e-1, rtol=1e-1), "bf16 mismatch"

    print("KERNEL_OK")
</pallas_src>

<mosaic_0001>
module attributes {stable_mosaic.version = 11 : i64} {
  func.func @_layernorm_kernel(%arg0: i32, %arg1: memref<1xf32, #tpu.memory_space<smem>>, %arg2: memref<1xf32, #tpu.memory_space<smem>>, %arg3: memref<8x32xf32, #tpu.memory_space<vmem>>, %arg4: memref<8x32xf32, #tpu.memory_space<vmem>>) attributes {dimension_semantics = [#tpu.dimension_semantics<parallel>], iteration_bounds = array<i64: 2>, scalar_prefetch = 0 : i64, scratch_operands = 0 : i64, tpu.core_type = #tpu.core_type<tc>, window_params = [{transform_indices = @transform_0, window_bounds = array<i64: 1>}, {transform_indices = @transform_1, window_bounds = array<i64: 1>}, {transform_indices = @transform_2, window_bounds = array<i64: 8, 32>}, {transform_indices = @transform_3, window_bounds = array<i64: 8, 32>}]} {
    %c0 = arith.constant 0 : index
    %c0_0 = arith.constant 0 : index
    %0 = vector.load %arg3[%c0, %c0_0] : memref<8x32xf32, #tpu.memory_space<vmem>>, vector<8x32xf32>
    %cst = arith.constant dense<0.000000e+00> : vector<8xf32>
    %1 = vector.multi_reduction <add>, %0, %cst [1] : vector<8x32xf32> to vector<8xf32>
    %2 = vector.shape_cast %1 : vector<8xf32> to vector<8x1xf32>
    %3 = arith.mulf %0, %0 : vector<8x32xf32>
    %cst_1 = arith.constant dense<0.000000e+00> : vector<8xf32>
    %4 = vector.multi_reduction <add>, %3, %cst_1 [1] : vector<8x32xf32> to vector<8xf32>
    %5 = vector.shape_cast %4 : vector<8xf32> to vector<8x1xf32>
    %cst_2 = arith.constant 3.125000e-02 : f32
    %6 = vector.broadcast %cst_2 : f32 to vector<8x1xf32>
    %7 = arith.mulf %2, %6 : vector<8x1xf32>
    %8 = arith.mulf %7, %7 : vector<8x1xf32>
    %cst_3 = arith.constant 3.200000e+01 : f32
    %9 = vector.broadcast %cst_3 : f32 to vector<8x1xf32>
    %10 = arith.mulf %9, %8 : vector<8x1xf32>
    %11 = arith.subf %5, %10 : vector<8x1xf32>
    %cst_4 = arith.constant 0.000000e+00 : f32
    %12 = vector.broadcast %cst_4 : f32 to vector<8x1xf32>
    %13 = arith.maximumf %11, %12 : vector<8x1xf32>
    %cst_5 = arith.constant 0.0322580636 : f32
    %14 = vector.broadcast %cst_5 : f32 to vector<8x1xf32>
    %15 = arith.mulf %13, %14 : vector<8x1xf32>
    %16 = math.sqrt %15 : vector<8x1xf32>
    %cst_6 = arith.constant 9.99999997E-7 : f32
    %17 = vector.broadcast %cst_6 : f32 to vector<8x1xf32>
    %18 = arith.addf %16, %17 : vector<8x1xf32>
    %19 = tpu.reciprocal %18 : vector<8x1xf32> -> vector<8x1xf32>
    %c0_7 = arith.constant 0 : index
    %20 = memref.load %arg1[%c0_7] : memref<1xf32, #tpu.memory_space<smem>>
    %21 = vector.broadcast %20 : f32 to vector<8x1xf32>
    %22 = arith.mulf %21, %19 : vector<8x1xf32>
    %c0_8 = arith.constant 0 : index
    %23 = memref.load %arg2[%c0_8] : memref<1xf32, #tpu.memory_space<smem>>
    %24 = arith.mulf %7, %22 : vector<8x1xf32>
    %25 = vector.broadcast %23 : f32 to vector<8x1xf32>
    %26 = arith.subf %25, %24 : vector<8x1xf32>
    %27 = vector.broadcast %22 : vector<8x1xf32> to vector<8x32xf32>
    %28 = arith.mulf %0, %27 : vector<8x32xf32>
    %29 = vector.broadcast %26 : vector<8x1xf32> to vector<8x32xf32>
    %30 = arith.addf %28, %29 : vector<8x32xf32>
    %c0_9 = arith.constant 0 : index
    %c0_10 = arith.constant 0 : index
    %31 = vector.load %arg4[%c0_9, %c0_10] : memref<8x32xf32, #tpu.memory_space<vmem>>, vector<8x32xf32>
    tpu.vector_store %arg4[%c0_9, %c0_10], %30 {strides = array<i32>} : memref<8x32xf32, #tpu.memory_space<vmem>>, vector<8x32xf32>,
    return
  }
  func.func @transform_0(%arg0: i32) -> i32 {
    %c0_i32 = arith.constant 0 : i32
    %c0_i32_0 = arith.constant 0 : i32
    return %c0_i32 : i32
  }
  func.func @transform_1(%arg0: i32) -> i32 {
    %c0_i32 = arith.constant 0 : i32
    %c0_i32_0 = arith.constant 0 : i32
    return %c0_i32 : i32
  }
  func.func @transform_2(%arg0: i32) -> (i32, i32) {
    %c0_i32 = arith.constant 0 : i32
    %c0_i32_0 = arith.constant 0 : i32
    return %arg0, %c0_i32 : i32, i32
  }
  func.func @transform_3(%arg0: i32) -> (i32, i32) {
    %c0_i32 = arith.constant 0 : i32
    %c0_i32_0 = arith.constant 0 : i32
    return %arg0, %c0_i32 : i32, i32
  }
}

</mosaic_0001>

<bundles_post_ra>
// kernel: layer_normalization.1
= control target key start
LH: loop header
LB: loop body
LE: loop exit
PB: predicated region body
PF: predicated region fallthrough
CT: control target
= control target key end

     0   :  { %s662_s0 = inlined_call_operand.<no memory space> [shape: f32[1], index: 0, kind: input, shape index: {}]   ;;  %s663_s1 = inlined_call_operand.<no memory space> [shape: f32[1], index: 1, kind: input, shape index: {}]   ;;  %s664_s2 = inlined_call_operand.hbm [shape: f32[16,32], index: 2, kind: input, shape index: {}]   ;;  %s665_s3 = inlined_call_operand.hbm [shape: f32[16,32], index: 3, kind: output, shape index: {}]  }
   0x1   :  { %8 = sst [smem:[#allocation2]] %s662_s0 }
   0x2   :  { %9 = sst [smem:[#allocation3]] %s663_s1 }
   0x3   :  { %10 = vsyncpa [#allocation5], 0 }
   0x4   :  { %12 = vsyncpa [#allocation5 + $0x1], 0 }
   0x5   :  { %13 = vsyncpa [#allocation6], 0 }
   0x6   :  { %15 = vsyncpa [#allocation6 + $0x1], 0  ;;  %s494_s16 = smov 0   ;;  %s496_s17 = smov 0  }
   0x7   :  { %s498_s18 = smov 0   ;;  %s500_s19 = smov 0  }
   0x8 LB: > { %s515_s0 = sadd.s32 4294967295, %s464_s19   ;;  %s306_s1 = sadd.s32 4294967294, %s464_s19   ;;  %s464_s19 = sphi %s500_s19, %s680_s19   ;;  %s460_s18 = sphi %s498_s18, %s679_s18   ;;  %s456_s17 = sphi %s496_s17, %s678_s17   ;;  %s452_s16 = sphi %s494_s16, %s677_s16  }
   0x9   : > { %s519_s20 = sadd.s32 1, %s464_s19   ;;  %s70_s21 = sadd.s32 1, %s460_s18 }
   0xa   : > { %s67_s22 = ssub.s32 %s464_s19, %s519_s20  ;;  %p77_p0 = scmp.ne.s32.totalorder %s460_s18, %s456_s17 }
   0xb   : > { %p68_p1 = scmp.eq.s32.totalorder %s67_s22, 0  ;;  %p78_p2 = scmp.eq.s32.totalorder %s464_s19, 0 }
   0xc   : > { %p83_p3 = scmp.ne.s32.totalorder %s456_s17, %s452_s16  ;;  %p84_p4 = scmp.eq.s32.totalorder %s515_s0, 0 }
   0xd   : > { %s531_s23 = scalar_select %p68_p1, %s460_s18, %s70_s21  }
   0xe   : > { %p533_p5 = por %p78_p2, %p77_p0  ;;  %p537_p6 = por %p84_p4, %p83_p3 }
   0xf   : > { %p107_p7 = scmp.eq.s32.totalorder %s515_s0, 1  ;;  %p113_p8 = scmp.eq.s32.totalorder %s306_s1, 1 }
  0x10   : > { %p330_p10 = scmp.lt.s32.totalorder %s464_s19, 2  ;;  %s139_s28 = sand.u32 1, %s460_s18  }
  0x11   : > { %p544_p11 = por %p107_p7, %p77_p0  ;;  %p548_p12 = por %p113_p8, %p83_p3 }
  0x12   : > { %s310_s29 = sshll.u32 %s464_s19, 7  ;;  %s309_s30 = sshll.u32 %s139_s28, 3 }
  0x13   : > { %s669_s26 = scalar_select %p544_p11, 1, 0 }
  0x14   : > { %s670_s27 = scalar_select %p548_p12, 1, 0 }
  0x15   : > { %s557_s6 = scalar_lea.hbm %s664_s2, %s310_s29  ;;  %s143_s7 = scalar_lea.vmem [#allocation4], %s309_s30 }
  0x16   : > { %s150_s8 = sshll.u32 %s143_s7, 4  ;;  %p561_p13 = pnand %p330_p10, %p533_p5  ;;  %s565_s8 = int_to_ptr.vmem [resolvable:$true] %s150_s8 }
  0x17   : > { %s140_s10 = scalar_lea.sflag [#allocation5], %s139_s28  ;;  %s368_s11 = scalar_lea.hbm %s557_s6, 128 }
  0x18   : > { %p369_p2 = scmp.ne.s32.totalorder %s557_s6, %s368_s11  ;;  %p370_p3 = pneg %p561_p13 }
  0x19   : > { %s373_s14 = scalar_lea.hbm %s664_s2, 256  ;;  %p374_p5 = scmp.lt.u32.totalorder %s557_s6, %s664_s2 }
  0x1a   : > { %p371_p4 = pnand %p370_p3, %p369_p2  ;;  %p375_p8 = scmp.lt.u32.totalorder %s373_s14, %s368_s11 }
  0x1b   : > { %p377_p9 = scmp.lt.u32.totalorder %s368_s11, %s557_s6 }
  0x1c   : > { %p372_p7 = pneg %p371_p4  ;;  %p376_p10 = por %p375_p8, %p374_p5 }
  0x1e   : > { %p378_p0 = por %p377_p9, %p376_p10 }
  0x20   : > { %p379_p1 = pnand %p378_p0, %p372_p7 }
  0x22   : > { %382 = shalt.err (!%p379_p1)
}
  0x23   : > { %s383_s21 = scalar_lea.vmem %s565_s8, 128  ;;  %s466_s22 = smov [#allocation4]  }
  0x24   : > { %p384_p2 = scmp.ne.s32.totalorder %s565_s8, %s383_s21  ;;  %s388_s24 = sshll.u32 %s466_s22, 4  ;;  %s389_s24 = int_to_ptr.vmem [resolvable:$false] %s388_s24 }
  0x25   : > { %s390_s28 = scalar_lea.vmem %s389_s24, 256  ;;  %p391_p11 = scmp.lt.s32.totalorder %s565_s8, %s389_s24 }
  0x26   : > { %p386_p4 = pnand %p384_p2, %p370_p3  ;;  %p392_p5 = scmp.lt.s32.totalorder %s390_s28, %s383_s21 }
  0x28   : > { %p387_p12 = pneg %p386_p4  ;;  %p393_p8 = por %p392_p5, %p391_p11 }
  0x2a   : > { %p394_p9 = pnand %p393_p8, %p387_p12 }
  0x2c   : > { %397 = shalt.err (!%p394_p9)
}
  0x2d   : > { %325 = dma.hbm_to_vmem [thread:$0]  (!%p561_p13), %s557_s6, 128, %s565_s8, %s140_s10  }
  0x2e   : > { %p672_p0 = scmp.lt.s32.totalorder %s464_s19, 3  ;;  %p673_p1 = scmp.ge.s32.totalorder %s464_s19, 1 }
  0x30   : > { %p156_p3 = pnand %p673_p1, %p672_p0 }
  0x31   : > { %s599_s29 = sand.u32 (!%p156_p3), 1, %s456_s17  }
  0x32   : > { %159 = sbr.rel (%p156_p3) target bundleno = 264 (0x108), region = 32  ;;  %s312_s30 = sshll.u32 (!%p156_p3), %s599_s29, 3 }
  0x33   : > { %s162_s4 = scalar_lea.sflag (!%p156_p3), [#allocation5], %s599_s29  ;;  %s165_s5 = scalar_lea.vmem (!%p156_p3), [#allocation4], %s312_s30 }
  0x39   : > { %443 = dma.done.wait (%p537_p6), %s162_s4, 128  }
  0x3a   : > { %445 = vsyncadd (%p537_p6), %s162_s4, 4294967168  ;;  %vm189_vm0 = vcmask 261120   ;;  %v188_v0 = vld [vmem:[%s165_s5] sm:$0xff]  ;;  %s212_s25 = sld [smem:[#allocation2]]  ;;  %s315_s7 = sshll.u32 %s515_s0, 7 }
  0x3b   : > { %v190_v1 = vsel %vm189_vm0, %v188_v0, 0.0  ;;  %v193_v2 = vmul.f32 %v188_v0, %v188_v0  ;;  %s215_s6 = sld [smem:[#allocation3]]  ;;  %s187_s8 = scalar_lea.vmem [#allocation7], %s312_s30 }
  0x3c   : > { %191 = vadd.xlane.f32.xlu0 %v190_v1  ;;  %s236_s9 = sshll.u32 %s187_s8, 4  ;;  %s617_s12 = scalar_lea.hbm %s665_s3, %s315_s7  ;;  %s619_s9 = int_to_ptr.vmem [resolvable:$true] %s236_s9 }
  0x3d   : > { %v194_v3 = vsel %vm189_vm0, %v193_v2, 0.0  ;;  %s223_s13 = scalar_lea.sflag [#allocation6], %s599_s29  ;;  %s398_s0 = scalar_lea.vmem %s619_s9, 128 }
  0x3e   : > { %p399_p6 = scmp.ne.s32.totalorder %s619_s9, %s398_s0  ;;  %p674_p11 = scmp.ne.s32.totalorder %s669_s26, 0 }
  0x3f   : > { %s467_s14 = smov [#allocation7]  }
  0x40   : > { %195 = vadd.xlane.f32.xlu0 %v194_v3  ;;  %v213_v18 = vstv %s212_s25  ;;  %p400_p12 = pnand %p399_p6, %p674_p11  ;;  %s402_s15 = sshll.u32 %s467_s14, 4  ;;  %s403_s15 = int_to_ptr.vmem [resolvable:$false] %s402_s15 }
  0x41   : > { %v217_v21 = vstv %s215_s6  ;;  %s404_s1 = scalar_lea.vmem %s403_s15, 256  ;;  %p405_p7 = scmp.lt.s32.totalorder %s619_s9, %s403_s15 }
  0x42   : > { %p401_p13 = pneg %p400_p12  ;;  %p406_p10 = scmp.lt.s32.totalorder %s404_s1, %s398_s0 }
  0x44   : > { %p407_p2 = por %p406_p10, %p405_p7 }
  0x46   : > { %p408_p4 = pnand %p407_p2, %p401_p13 }
  0xc9   : > { %v192_v4 = vpop.xlane.xlu0 %191 }
  0xca   : > { %v197_v5 = vmul.f32 0.03125, %v192_v4 }
  0xcc   : > { %v198_v6 = vmul.f32 %v197_v5, %v197_v5 }
  0xcd   : > { %v196_v7 = vpop.xlane.xlu0 %195 }
  0xce   : > { %v199_v8 = vmul.f32 32.0, %v198_v6 }
  0xd0   : > { %v200_v9 = vsub.f32 %v196_v7, %v199_v8 }
  0xd2   : > { %v201_v10 = vmax.f32 %v200_v9, 0.0 }
  0xd4   : > { %v202_v11 = vmul.f32 0.032258064, %v201_v10 }
  0xd6   : > { %364 = vrsqrt.f32 %v202_v11  ;;  %vm205_vm1 = vcmp.eq.f32.partialorder %v202_v11, inf  ;;  %v208_v14 = vand.u32 2147483648, %v202_v11  ;;  %vm207_vm2 = vcmp.eq.f32.partialorder %v202_v11, 0.0 }
  0xe0   : > { %v365_v12 = vpop.eup %364 }
  0xe1   : > { %v204_v13 = vmul.f32 %v365_v12, %v202_v11 }
  0xe3   : > { %v206_v15 = vsel %vm205_vm1, %v202_v11, %v204_v13 }
  0xe4   : > { %v209_v16 = vsel %vm207_vm2, %v208_v14, %v206_v15 }
  0xe5   : > { %v210_v17 = vadd.f32 1e-06, %v209_v16 }
  0xe7   : > { %366 = vrcp.f32 %v210_v17 }
  0xf1   : > { %v367_v19 = vpop.eup %366 }
  0xf2   : > { %v214_v20 = vmul.f32 %v367_v19, %v213_v18 }
  0xf4   : > { %v216_v22 = vmul.f32 %v214_v20, %v197_v5  ;;  %v219_v24 = vmul.f32 %v214_v20, %v188_v0 }
  0xf6   : > { %v218_v23 = vsub.f32 %v217_v21, %v216_v22 }
  0xf8   : > { %v220_v25 = vadd.f32 %v219_v24, %v218_v23 }
  0xfa   : > { %221 = vst.msk [vmem:[%s187_s8] sm:$0xff] %vm189_vm0, %v220_v25 }
  0xfb   : > { %411 = shalt.err (!%p408_p4)
}
  0xfc   : > { %s412_s21 = scalar_lea.hbm %s617_s12, 128  ;;  %s416_s28 = scalar_lea.hbm %s665_s3, 256 }
  0xfd   : > { %p413_p5 = scmp.ne.s32.totalorder %s617_s12, %s412_s21  ;;  %p417_p0 = scmp.lt.u32.totalorder %s617_s12, %s665_s3 }
  0xfe   : > { %p418_p1 = scmp.lt.u32.totalorder %s416_s28, %s412_s21  ;;  %p420_p6 = scmp.lt.u32.totalorder %s412_s21, %s617_s12 }
  0xff   : > { %p414_p8 = pnand %p413_p5, %p674_p11 }
 0x100   : > { %p419_p3 = por %p418_p1, %p417_p0 }
 0x101   : > { %p415_p9 = pneg %p414_p8 }
 0x102   : > { %p421_p12 = por %p420_p6, %p419_p3 }
 0x104   : > { %p422_p13 = pnand %p421_p12, %p415_p9 }
 0x106   : > { %425 = shalt.err (!%p422_p13)
}
 0x107   : > { %320 = dma.vmem_to_hbm [thread:$0]  (%p674_p11), %s619_s9, 128, %s617_s12, %s223_s13  }
 0x108 PF: > { %s248_s4 = sand.u32 1, %s452_s16   ;;  %p675_p7 = scmp.ne.s32.totalorder %s670_s27, 0 }
 0x109   : > { %p676_p10 = scmp.ge.s32.totalorder %s464_s19, 2  ;;  %s249_s5 = scalar_lea.sflag [#allocation6], %s248_s4 }
 0x10b   : > { %p327_p2 = pnand %p676_p10, %p675_p7 }
 0x10d   : > { %447 = dma.done.wait (!%p327_p2), %s249_s5, 128  }
 0x10e   : > { %449 = vsyncadd (!%p327_p2), %s249_s5, 4294967168  ;;  %p18_p4 = scmp.ge.s32.totalorder %s519_s20, 4   ;;  %s677_s16 = smov %s456_s17 }
 0x10f   : > { %s678_s17 = smov %s460_s18  ;;  %s679_s18 = smov %s531_s23 }
 0x110   : > { %s680_s19 = smov %s519_s20  ;;  %20 = sbr.rel (!%p18_p4) target bundleno = 8 (0x8), region = 77 }
 0x117   :  { %254 = vsyncpa [#allocation5], 1 }
 0x118   :  { %256 = vsyncpa [#allocation5 + $0x1], 1 }
 0x119   :  { %257 = vsyncpa [#allocation6], 1 }
 0x11a   :  { %259 = vsyncpa [#allocation6 + $0x1], 1 }

</bundles_post_ra>
